<compile_context>
chip_gen: v5e
topology: v5e:2x2
jax: 0.10.0
libtpu: 0.0.40
codegen_flags: <defaults>
</compile_context>

<pallas_src>
import functools

import numpy as np
import jax
import jax.numpy as jnp
from jax.experimental import pallas as pl
from jax.experimental.pallas import tpu as pltpu

_BN_EPS = 1e-5


def _round_up(v, m):
    return (v + m - 1) // m * m


def _fr_kernel(x_ref, w_ref, gamma_ref, beta_ref, o_ref,
               sum_ref, ssq_ref, scale_ref, shift_ref, *, n_valid, eps):
    # x_ref:     (TN, Kp) bf16  rows = (b, oh, ow), lanes = [even C_in | odd C_in | 0]
    # w_ref:     (Kp, Cp) bf16  block-diag [[W1, 0], [0, W2]] (zero padded)
    # gamma_ref: (1, Cp)  f32   BN scale (0 on pad lanes)
    # beta_ref:  (1, Cp)  f32   BN shift (0 on pad lanes)
    # o_ref:     (TN, Cp) f32
    # scratch:   sum/ssq/scale/shift, each (1, Cp) f32, persist across the grid
    p = pl.program_id(0)          # 0 = stats pass, 1 = normalize pass
    i = pl.program_id(1)          # row tile

    x = jnp.maximum(x_ref[...], 0)                          # ReLU on bf16 slab
    # Both stride-2 1x1 convs + channel concat as one MXU matmul (f32 acc).
    y = jnp.dot(x, w_ref[...], preferred_element_type=jnp.float32)

    @pl.when(p == 0)
    def _stats():
        @pl.when(i == 0)
        def _init():
            sum_ref[...] = jnp.zeros_like(sum_ref)
            ssq_ref[...] = jnp.zeros_like(ssq_ref)

        # Single pass over y for both first and second moments (f32 accum).
        sum_ref[...] += jnp.sum(y, axis=0, keepdims=True)
        ssq_ref[...] += jnp.sum(y * y, axis=0, keepdims=True)

        @pl.when(i == pl.num_programs(1) - 1)
        def _finalize():
            inv_n = 1.0 / n_valid
            mean = sum_ref[...] * inv_n
            var = jnp.maximum(ssq_ref[...] * inv_n - mean * mean, 0.0)
            scale = gamma_ref[...] * jax.lax.rsqrt(var + eps)
            scale_ref[...] = scale
            shift_ref[...] = beta_ref[...] - mean * scale    # fold BN affine

    @pl.when(p == 1)
    def _normalize():
        o_ref[...] = y * scale_ref[...] + shift_ref[...]


def factorized_reduce(x, params, eps=_BN_EPS):
    """FactorizedReduce forward (training-mode BatchNorm).

    x: (B, C_in, H, W) f32 NCHW (H, W even).
    params = (w1, w2, gamma, beta) with torch shapes
      w1, w2: (C_out//2, C_in, 1, 1)   gamma, beta: (C_out,)
    Returns (B, C_out, H//2, W//2) f32.
    """
    w1, w2, gamma, beta = params
    B, C_in, H, W = x.shape
    assert H % 2 == 0 and W % 2 == 0, "even spatial size expected"
    Ho, Wo = H // 2, W // 2
    C_half = w1.shape[0]
    C_out = 2 * C_half
    N = B * Ho * Wo

    # ---- layout plumbing (wrapper-side, pure data movement) ----
    # Cast to bf16 BEFORE the big phase-subsample + transpose: halves the HBM
    # traffic of the dominant data movement and ships a bf16 MXU operand.
    # ReLU commutes with both the sub-sampling and the cast.
    x1 = jnp.transpose(x[:, :, 0::2, 0::2].astype(jnp.bfloat16),
                       (0, 2, 3, 1)).reshape(N, C_in)
    x2 = jnp.transpose(x[:, :, 1::2, 1::2].astype(jnp.bfloat16),
                       (0, 2, 3, 1)).reshape(N, C_in)
    x_cat = jnp.concatenate([x1, x2], axis=1)               # (N, 2*C_in) bf16

    # Lane padding to 128 (unmasked, lane-dense loads/stores); rows to the
    # bf16 sublane-packing granule (16) and to the row-tile size.
    Kp = _round_up(2 * C_in, 128)
    Cp = _round_up(C_out, 128)
    TN = 512 if N >= 512 else _round_up(N, 16)               # row tile
    Np = _round_up(N, TN)
    num_tiles = Np // TN

    x_pad = jnp.pad(x_cat, ((0, Np - N), (0, Kp - 2 * C_in)))

    # Block-diagonal combined weight: [x1 | x2] @ [[W1,0],[0,W2]] = [y1 | y2].
    w1m = jnp.transpose(w1[:, :, 0, 0]).astype(jnp.bfloat16)   # (C_in, C_half)
    w2m = jnp.transpose(w2[:, :, 0, 0]).astype(jnp.bfloat16)
    w_comb = jnp.zeros((2 * C_in, C_out), jnp.bfloat16)
    w_comb = w_comb.at[:C_in, :C_half].set(w1m).at[C_in:, C_half:].set(w2m)
    w_pad = jnp.pad(w_comb, ((0, Kp - 2 * C_in), (0, Cp - C_out)))

    gamma_pad = jnp.pad(gamma.astype(jnp.float32).reshape(1, -1),
                        ((0, 0), (0, Cp - C_out)))
    beta_pad = jnp.pad(beta.astype(jnp.float32).reshape(1, -1),
                       ((0, 0), (0, Cp - C_out)))

    kern = functools.partial(_fr_kernel, n_valid=float(N), eps=eps)

    # Resident VMEM (default double-buffering) + scratch; generous margin.
    vmem_bytes = (2 * TN * Kp * 2 + 2 * Kp * Cp * 2 + 4 * Cp * 4
                  + 2 * TN * Cp * 4 + 4 * Cp * 4)
    vmem_limit = int(min(max(2 * vmem_bytes, 16 * 1024 * 1024),
                         64 * 1024 * 1024))

    flops = 2 * (2 * Np * Kp * Cp) + 2 * Np * Kp + 6 * Np * Cp
    bytes_accessed = 2 * (Np * Kp * 2) + Kp * Cp * 2 + 2 * Cp * 4 + Np * Cp * 4

    out = pl.pallas_call(
        kern,
        out_shape=jax.ShapeDtypeStruct((Np, Cp), jnp.float32),
        grid=(2, num_tiles),                                  # (pass, row tile)
        in_specs=[
            pl.BlockSpec((TN, Kp), lambda p, i: (i, 0)),      # x tile (both passes)
            pl.BlockSpec((Kp, Cp), lambda p, i: (0, 0)),      # weight, resident
            pl.BlockSpec((1, Cp), lambda p, i: (0, 0)),       # gamma
            pl.BlockSpec((1, Cp), lambda p, i: (0, 0)),       # beta
        ],
        # During the stats pass the output block index is pinned to 0, so the
        # output is only DMA'd back to HBM once, during the normalize pass.
        out_specs=pl.BlockSpec((TN, Cp), lambda p, i: (p * i, 0)),
        scratch_shapes=[pltpu.VMEM((1, Cp), jnp.float32),     # sum
                        pltpu.VMEM((1, Cp), jnp.float32),     # sum of squares
                        pltpu.VMEM((1, Cp), jnp.float32),     # folded scale
                        pltpu.VMEM((1, Cp), jnp.float32)],    # folded shift
        compiler_params=pltpu.CompilerParams(
            dimension_semantics=("arbitrary", "arbitrary"),
            vmem_limit_bytes=vmem_limit),
        cost_estimate=pl.CostEstimate(flops=flops, transcendentals=Cp,
                                      bytes_accessed=bytes_accessed),
    )(x_pad, w_pad, gamma_pad, beta_pad)

    out = out[:N, :C_out].reshape(B, Ho, Wo, C_out)
    return jnp.transpose(out, (0, 3, 1, 2))                   # back to NCHW


def factorized_reduce_reference(x, params, eps=_BN_EPS):
    """Pure-JAX reference with identical semantics (training-mode BN)."""
    w1, w2, gamma, beta = params
    x = jnp.maximum(x, 0.0)
    y1 = jnp.einsum('bchw,oc->bohw', x[:, :, 0::2, 0::2], w1[:, :, 0, 0])
    y2 = jnp.einsum('bchw,oc->bohw', x[:, :, 1::2, 1::2], w2[:, :, 0, 0])
    y = jnp.concatenate([y1, y2], axis=1)
    mean = jnp.mean(y, axis=(0, 2, 3), keepdims=True)
    var = jnp.mean((y - mean) ** 2, axis=(0, 2, 3), keepdims=True)   # biased
    y = (y - mean) * jax.lax.rsqrt(var + eps)
    return y * gamma.reshape(1, -1, 1, 1) + beta.reshape(1, -1, 1, 1)


if __name__ == "__main__":
    B, C_in, HW, C_out = 2, 4, 16, 16
    key = jax.random.PRNGKey(0)
    k1, k2, k3, k4, k5 = jax.random.split(key, 5)

    x = jax.random.normal(k1, (B, C_in, HW, HW), jnp.float32)
    w1 = 0.3 * jax.random.normal(k2, (C_out // 2, C_in, 1, 1), jnp.float32)
    w2 = 0.3 * jax.random.normal(k3, (C_out // 2, C_in, 1, 1), jnp.float32)
    gamma = 1.0 + 0.1 * jax.random.normal(k4, (C_out,), jnp.float32)
    beta = 0.1 * jax.random.normal(k5, (C_out,), jnp.float32)
    params = (w1, w2, gamma, beta)

    out = jax.block_until_ready(factorized_reduce(x, params))
    ref = jax.block_until_ready(factorized_reduce_reference(x, params))

    # bf16 MXU operands with f32 accumulation -> a few % worst-case deviation
    # vs. the f32 PyTorch conv.
    np.testing.assert_allclose(np.asarray(out), np.asarray(ref),
                               rtol=3e-2, atol=3e-2)
    assert out.shape == (B, C_out, HW // 2, HW // 2)
    assert out.dtype == jnp.float32
    print("KERNEL_OK")
</pallas_src>

<mosaic_0001>
module attributes {stable_mosaic.version = 11 : i64} {
  func.func @_fr_kernel(%arg0: i32, %arg1: i32, %arg2: memref<128x128xbf16, #tpu.memory_space<vmem>>, %arg3: memref<128x128xbf16, #tpu.memory_space<vmem>>, %arg4: memref<1x128xf32, #tpu.memory_space<vmem>>, %arg5: memref<1x128xf32, #tpu.memory_space<vmem>>, %arg6: memref<128x128xf32, #tpu.memory_space<vmem>>, %arg7: memref<1x128xf32, #tpu.memory_space<vmem>>, %arg8: memref<1x128xf32, #tpu.memory_space<vmem>>, %arg9: memref<1x128xf32, #tpu.memory_space<vmem>>, %arg10: memref<1x128xf32, #tpu.memory_space<vmem>>) attributes {dimension_semantics = [#tpu.dimension_semantics<arbitrary>, #tpu.dimension_semantics<arbitrary>], iteration_bounds = array<i64: 2, 1>, scalar_prefetch = 0 : i64, scratch_operands = 4 : i64, tpu.core_type = #tpu.core_type<tc>, window_params = [{transform_indices = @transform_0, window_bounds = array<i64: 128, 128>}, {pipeline_mode = #tpu.pipeline_mode<synchronous>, transform_indices = @transform_1, window_bounds = array<i64: 128, 128>}, {pipeline_mode = #tpu.pipeline_mode<synchronous>, transform_indices = @transform_2, window_bounds = array<i64: 1, 128>}, {pipeline_mode = #tpu.pipeline_mode<synchronous>, transform_indices = @transform_3, window_bounds = array<i64: 1, 128>}, {transform_indices = @transform_4, window_bounds = array<i64: 128, 128>}]} {
    %c0 = arith.constant 0 : index
    %c0_0 = arith.constant 0 : index
    %0 = vector.load %arg2[%c0, %c0_0] : memref<128x128xbf16, #tpu.memory_space<vmem>>, vector<128x128xbf16>
    %cst = arith.constant 0.000000e+00 : bf16
    %1 = vector.broadcast %cst : bf16 to vector<128x128xbf16>
    %2 = arith.maximumf %0, %1 : vector<128x128xbf16>
    %c0_1 = arith.constant 0 : index
    %c0_2 = arith.constant 0 : index
    %3 = vector.load %arg3[%c0_1, %c0_2] : memref<128x128xbf16, #tpu.memory_space<vmem>>, vector<128x128xbf16>
    %cst_3 = arith.constant dense<0.000000e+00> : vector<128x128xf32>
    %4 = tpu.matmul %2, %3, %cst_3 {dimension_numbers = #tpu.dot_dimension_numbers<[1], [0], [0], [1], [0, 0, 1, 1], [], []>} : vector<128x128xbf16>, vector<128x128xbf16>, vector<128x128xf32> -> vector<128x128xf32>
    %c0_i32 = arith.constant 0 : i32
    %5 = arith.cmpi eq, %arg0, %c0_i32 : i32
    %6 = arith.extui %5 : i1 to i32
    %c0_i32_4 = arith.constant 0 : i32
    %7 = arith.cmpi ne, %6, %c0_i32_4 : i32
    scf.if %7 {
      %c0_i32_6 = arith.constant 0 : i32
      %11 = arith.cmpi eq, %arg1, %c0_i32_6 : i32
      %12 = arith.extui %11 : i1 to i32
      %c0_i32_7 = arith.constant 0 : i32
      %13 = arith.cmpi ne, %12, %c0_i32_7 : i32
      scf.if %13 {
        %cst_20 = arith.constant 0.000000e+00 : f32
        %28 = vector.broadcast %cst_20 : f32 to vector<1x128xf32>
        %c0_21 = arith.constant 0 : index
        %c0_22 = arith.constant 0 : index
        %29 = vector.load %arg7[%c0_21, %c0_22] : memref<1x128xf32, #tpu.memory_space<vmem>>, vector<1x128xf32>
        tpu.vector_store %arg7[%c0_21, %c0_22], %28 {strides = array<i32>} : memref<1x128xf32, #tpu.memory_space<vmem>>, vector<1x128xf32>,
        %cst_23 = arith.constant 0.000000e+00 : f32
        %30 = vector.broadcast %cst_23 : f32 to vector<1x128xf32>
        %c0_24 = arith.constant 0 : index
        %c0_25 = arith.constant 0 : index
        %31 = vector.load %arg8[%c0_24, %c0_25] : memref<1x128xf32, #tpu.memory_space<vmem>>, vector<1x128xf32>
        tpu.vector_store %arg8[%c0_24, %c0_25], %30 {strides = array<i32>} : memref<1x128xf32, #tpu.memory_space<vmem>>, vector<1x128xf32>,
      } else {
      }
      %c0_8 = arith.constant 0 : index
      %c0_9 = arith.constant 0 : index
      %14 = vector.load %arg7[%c0_8, %c0_9] : memref<1x128xf32, #tpu.memory_space<vmem>>, vector<1x128xf32>
      %cst_10 = arith.constant dense<0.000000e+00> : vector<128xf32>
      %15 = vector.multi_reduction <add>, %4, %cst_10 [0] : vector<128x128xf32> to vector<128xf32>
      %16 = vector.shape_cast %15 : vector<128xf32> to vector<1x128xf32>
      %17 = arith.addf %14, %16 : vector<1x128xf32>
      %c0_11 = arith.constant 0 : index
      %c0_12 = arith.constant 0 : index
      %18 = vector.load %arg7[%c0_11, %c0_12] : memref<1x128xf32, #tpu.memory_space<vmem>>, vector<1x128xf32>
      tpu.vector_store %arg7[%c0_11, %c0_12], %17 {strides = array<i32>} : memref<1x128xf32, #tpu.memory_space<vmem>>, vector<1x128xf32>,
      %c0_13 = arith.constant 0 : index
      %c0_14 = arith.constant 0 : index
      %19 = vector.load %arg8[%c0_13, %c0_14] : memref<1x128xf32, #tpu.memory_space<vmem>>, vector<1x128xf32>
      %20 = arith.mulf %4, %4 : vector<128x128xf32>
      %cst_15 = arith.constant dense<0.000000e+00> : vector<128xf32>
      %21 = vector.multi_reduction <add>, %20, %cst_15 [0] : vector<128x128xf32> to vector<128xf32>
      %22 = vector.shape_cast %21 : vector<128xf32> to vector<1x128xf32>
      %23 = arith.addf %19, %22 : vector<1x128xf32>
      %c0_16 = arith.constant 0 : index
      %c0_17 = arith.constant 0 : index
      %24 = vector.load %arg8[%c0_16, %c0_17] : memref<1x128xf32, #tpu.memory_space<vmem>>, vector<1x128xf32>
      tpu.vector_store %arg8[%c0_16, %c0_17], %23 {strides = array<i32>} : memref<1x128xf32, #tpu.memory_space<vmem>>, vector<1x128xf32>,
      %c0_i32_18 = arith.constant 0 : i32
      %25 = arith.cmpi eq, %arg1, %c0_i32_18 : i32
      %26 = arith.extui %25 : i1 to i32
      %c0_i32_19 = arith.constant 0 : i32
      %27 = arith.cmpi ne, %26, %c0_i32_19 : i32
      scf.if %27 {
        %c0_20 = arith.constant 0 : index
        %c0_21 = arith.constant 0 : index
        %28 = vector.load %arg7[%c0_20, %c0_21] : memref<1x128xf32, #tpu.memory_space<vmem>>, vector<1x128xf32>
        %cst_22 = arith.constant 7.812500e-03 : f32
        %29 = vector.broadcast %cst_22 : f32 to vector<1x128xf32>
        %30 = arith.mulf %28, %29 : vector<1x128xf32>
        %c0_23 = arith.constant 0 : index
        %c0_24 = arith.constant 0 : index
        %31 = vector.load %arg8[%c0_23, %c0_24] : memref<1x128xf32, #tpu.memory_space<vmem>>, vector<1x128xf32>
        %cst_25 = arith.constant 7.812500e-03 : f32
        %32 = vector.broadcast %cst_25 : f32 to vector<1x128xf32>
        %33 = arith.mulf %31, %32 : vector<1x128xf32>
        %34 = arith.mulf %30, %30 : vector<1x128xf32>
        %35 = arith.subf %33, %34 : vector<1x128xf32>
        %cst_26 = arith.constant 0.000000e+00 : f32
        %36 = vector.broadcast %cst_26 : f32 to vector<1x128xf32>
        %37 = arith.maximumf %35, %36 : vector<1x128xf32>
        %c0_27 = arith.constant 0 : index
        %c0_28 = arith.constant 0 : index
        %38 = vector.load %arg4[%c0_27, %c0_28] : memref<1x128xf32, #tpu.memory_space<vmem>>, vector<1x128xf32>
        %cst_29 = arith.constant 9.99999974E-6 : f32
        %39 = vector.broadcast %cst_29 : f32 to vector<1x128xf32>
        %40 = arith.addf %37, %39 : vector<1x128xf32>
        %41 = math.rsqrt %40 : vector<1x128xf32>
        %42 = arith.mulf %38, %41 : vector<1x128xf32>
        %c0_30 = arith.constant 0 : index
        %c0_31 = arith.constant 0 : index
        %43 = vector.load %arg9[%c0_30, %c0_31] : memref<1x128xf32, #tpu.memory_space<vmem>>, vector<1x128xf32>
        tpu.vector_store %arg9[%c0_30, %c0_31], %42 {strides = array<i32>} : memref<1x128xf32, #tpu.memory_space<vmem>>, vector<1x128xf32>,
        %c0_32 = arith.constant 0 : index
        %c0_33 = arith.constant 0 : index
        %44 = vector.load %arg5[%c0_32, %c0_33] : memref<1x128xf32, #tpu.memory_space<vmem>>, vector<1x128xf32>
        %45 = arith.mulf %30, %42 : vector<1x128xf32>
        %46 = arith.subf %44, %45 : vector<1x128xf32>
        %c0_34 = arith.constant 0 : index
        %c0_35 = arith.constant 0 : index
        %47 = vector.load %arg10[%c0_34, %c0_35] : memref<1x128xf32, #tpu.memory_space<vmem>>, vector<1x128xf32>
        tpu.vector_store %arg10[%c0_34, %c0_35], %46 {strides = array<i32>} : memref<1x128xf32, #tpu.memory_space<vmem>>, vector<1x128xf32>,
      } else {
      }
    } else {
    }
    %c1_i32 = arith.constant 1 : i32
    %8 = arith.cmpi eq, %arg0, %c1_i32 : i32
    %9 = arith.extui %8 : i1 to i32
    %c0_i32_5 = arith.constant 0 : i32
    %10 = arith.cmpi ne, %9, %c0_i32_5 : i32
    scf.if %10 {
      %c0_6 = arith.constant 0 : index
      %c0_7 = arith.constant 0 : index
      %11 = vector.load %arg9[%c0_6, %c0_7] : memref<1x128xf32, #tpu.memory_space<vmem>>, vector<1x128xf32>
      %12 = vector.broadcast %11 : vector<1x128xf32> to vector<128x128xf32>
      %13 = arith.mulf %4, %12 : vector<128x128xf32>
      %c0_8 = arith.constant 0 : index
      %c0_9 = arith.constant 0 : index
      %14 = vector.load %arg10[%c0_8, %c0_9] : memref<1x128xf32, #tpu.memory_space<vmem>>, vector<1x128xf32>
      %15 = vector.broadcast %14 : vector<1x128xf32> to vector<128x128xf32>
      %16 = arith.addf %13, %15 : vector<128x128xf32>
      %c0_10 = arith.constant 0 : index
      %c0_11 = arith.constant 0 : index
      %17 = vector.load %arg6[%c0_10, %c0_11] : memref<128x128xf32, #tpu.memory_space<vmem>>, vector<128x128xf32>
      tpu.vector_store %arg6[%c0_10, %c0_11], %16 {strides = array<i32>} : memref<128x128xf32, #tpu.memory_space<vmem>>, vector<128x128xf32>,
    } else {
    }
    return
  }
  func.func @transform_0(%arg0: i32, %arg1: i32) -> (i32, i32) {
    %c0_i32 = arith.constant 0 : i32
    %c0_i32_0 = arith.constant 0 : i32
    return %arg1, %c0_i32 : i32, i32
  }
  func.func @transform_1(%arg0: i32, %arg1: i32) -> (i32, i32) {
    %c0_i32 = arith.constant 0 : i32
    %c0_i32_0 = arith.constant 0 : i32
    %c0_i32_1 = arith.constant 0 : i32
    return %c0_i32, %c0_i32_0 : i32, i32
  }
  func.func @transform_2(%arg0: i32, %arg1: i32) -> (i32, i32) {
    %c0_i32 = arith.constant 0 : i32
    %c0_i32_0 = arith.constant 0 : i32
    %c0_i32_1 = arith.constant 0 : i32
    return %c0_i32, %c0_i32_0 : i32, i32
  }
  func.func @transform_3(%arg0: i32, %arg1: i32) -> (i32, i32) {
    %c0_i32 = arith.constant 0 : i32
    %c0_i32_0 = arith.constant 0 : i32
    %c0_i32_1 = arith.constant 0 : i32
    return %c0_i32, %c0_i32_0 : i32, i32
  }
  func.func @transform_4(%arg0: i32, %arg1: i32) -> (i32, i32) {
    %0 = arith.muli %arg0, %arg1 : i32
    %c0_i32 = arith.constant 0 : i32
    %c0_i32_0 = arith.constant 0 : i32
    return %0, %c0_i32 : i32, i32
  }
}

</mosaic_0001>

<bundles_post_ra>
// kernel: tpu_custom_call.1
= control target key start
LH: loop header
LB: loop body
LE: loop exit
PB: predicated region body
PF: predicated region fallthrough
CT: control target
= control target key end

     0   :  { %9 = vsyncpa [#allocation7], 0  ;;  %s1178_s0 = inlined_call_operand.hbm [shape: bf16[128,128], index: 0, kind: input, shape index: {}]   ;;  %s1179_s1 = inlined_call_operand.hbm [shape: bf16[128,128], index: 1, kind: input, shape index: {}]   ;;  %s1180_s2 = inlined_call_operand.vmem [shape: f32[1,128], index: 2, kind: input, shape index: {}]   ;;  %s1181_s3 = inlined_call_operand.vmem [shape: f32[1,128], index: 3, kind: input, shape index: {}]   ;;  %s1182_s4 = inlined_call_operand.hbm [shape: f32[128,128], index: 4, kind: output, shape index: {}]  }
   0x1   :  { %10 = vsyncpa [#allocation10], 0 }
   0x2   :  { %11 = vsyncpa [#allocation8], 0 }
   0x3   :  { %13 = vsyncpa [#allocation8 + $0x1], 0  ;;  %s1005_s15 = smov 0   ;;  %s1007_s16 = smov 0  }
   0x4   :  { %s1009_s17 = smov 0  }
   0x5 LB: > { %s665_s18 = sadd.s32 4294967295, %s970_s17   ;;  %s666_s19 = sadd.s32 4294967294, %s970_s17   ;;  %s970_s17 = sphi %s1009_s17, %s19_s17   ;;  %s966_s16 = sphi %s1007_s16, %s1186_s16   ;;  %s962_s15 = sphi %s1005_s15, %s1185_s15  }
   0x6   : > { %s31_s20 = sadd.s32 1, %s966_s16  ;;  %p667_p0 = scmp.ge.s32.totalorder %s970_s17, 1 }
   0x7   : > { %p33_p1 = scmp.ge.s32.totalorder %s31_s20, 2  ;;  %p153_p2 = scmp.lt.s32.totalorder %s970_s17, 3 }
   0x8   : > { %p1027_p3 = scmp.eq.s32.totalorder %s665_s18, 0  ;;  %s167_s25 = sshll.u32 %s1178_s0, 4  ;;  %s168_s25 = int_to_ptr.hbm [resolvable:$true] %s167_s25 }
   0x9   : > { %s1188_s20 = smov (%p33_p1, %s31_s20), 0  ;;  %p1033_p4 = pnand %p667_p0, %p153_p2 }
   0xa   : > { %s972_s26 = smov [#allocation6]   ;;  %s181_s30 = sshll.u32 %s1179_s1, 4  ;;  %s182_s30 = int_to_ptr.hbm [resolvable:$true] %s181_s30 }
   0xb   : > { %p794_p5 = pneg %p1033_p4  ;;  %s169_s27 = sshll.u32 %s972_s26, 4  ;;  %s170_s27 = int_to_ptr.vmem [resolvable:$true] %s169_s27 }
   0xc   : > { %s973_s5 = smov 64   ;;  %s974_s6 = smov 4  }
   0xd   : > { %p795_p6 = pnand %p1027_p3, %p794_p5  ;;  %s975_s7 = smov [#allocation9]  }
   0xe   : > { %s183_s8 = sshll.u32 %s975_s7, 4  ;;  %205 = sbr.rel (%p1033_p4) target bundleno = 330 (0x14a), region = 36  ;;  %s184_s8 = int_to_ptr.vmem [resolvable:$true] %s183_s8 }
   0xf   : > { %797 = dma.hbm_to_vmem [thread:$0]  (!%p795_p6), %s168_s25, 1024, %s170_s27, [#allocation7], %s973_s5, %s973_s5, %s974_s6  }
  0x10   : > { %800 = dma.hbm_to_vmem [thread:$0]  (!%p795_p6), %s182_s30, 1024, %s184_s8, [#allocation10], %s973_s5, %s973_s5, %s974_s6  }
  0x13   : > { %949 = dma.done.wait (%p1027_p3), [#allocation7], 1024  }
  0x14   : > { %951 = vsyncadd (%p1027_p3), [#allocation7], 4294966272 }
  0x15   : > { %953 = dma.done.wait (%p1027_p3), [#allocation10], 1024  }
  0x16   : > { %955 = vsyncadd (%p1027_p3), [#allocation10], 4294966272  ;;  %v718_v0 = vld [vmem:[#allocation9 + $0x38] sm:$0xff]  ;;  %v717_v1 = vld [vmem:[#allocation9 + $0x30] sm:$0xff]  ;;  %p705_p7 = scmp.ne.s32.totalorder %s962_s15, 0 }
  0x17   : > { %355 = vmatpush.bf16.msra.mxu0 %v718_v0  ;;  %758 = vmatpush.bf16.msra.mxu1 %v718_v0  ;;  %v716_v2 = vld [vmem:[#allocation9 + $0x28] sm:$0xff]  ;;  %v715_v3 = vld [vmem:[#allocation9 + $0x20] sm:$0xff]  ;;  %v714_v4 = vld [vmem:[#allocation9 + $0x18] sm:$0xff] }
  0x18   : > { %759 = vmatpush.bf16.msra.mxu2 %v718_v0  ;;  %760 = vmatpush.bf16.msra.mxu3 %v718_v0  ;;  %v713_v5 = vld [vmem:[#allocation9 + $0x10] sm:$0xff]  ;;  %v720_v6 = vld [vmem:[#allocation6] sm:$0xff]   ;;  %v712_v14 = vld [vmem:[#allocation9 + $0x8] sm:$0xff] }
  0x19   : > { %v752_v7 = vld [vmem:[#allocation6 + $0x10] sm:$0xff]   ;;  %v754_v8 = vld [vmem:[#allocation6 + $0x20] sm:$0xff]   ;;  %v721_v10 = vunpack.c.l.bf16 %v720_v6  ;;  %v722_v11 = vunpack.c.h.bf16 %v720_v6  ;;  %v751_v32 = vld [vmem:[#allocation6 + $0x8] sm:$0xff]  }
  0x1a   : > { %v756_v9 = vld [vmem:[#allocation6 + $0x30] sm:$0xff]   ;;  %v729_v12 = vunpack.c.l.bf16 %v752_v7  ;;  %v730_v13 = vunpack.c.h.bf16 %v752_v7  ;;  %v737_v15 = vunpack.c.l.bf16 %v754_v8  ;;  %v738_v16 = vunpack.c.h.bf16 %v754_v8  ;;  %v711_v23 = vld [vmem:[#allocation9] sm:$0xff]  ;;  %v753_v33 = vld [vmem:[#allocation6 + $0x18] sm:$0xff]  }
  0x1b   : > { %356 = vmatpush.bf16.msra.mxu0 %v717_v1  ;;  %761 = vmatpush.bf16.msra.mxu1 %v717_v1  ;;  %v745_v17 = vunpack.c.l.bf16 %v756_v9  ;;  %v746_v18 = vunpack.c.h.bf16 %v756_v9  ;;  %v267_v19 = vmax.f32 %v721_v10, 0.0  ;;  %v268_v20 = vmax.f32 %v722_v11, 0.0  ;;  %v755_v34 = vld [vmem:[#allocation6 + $0x28] sm:$0xff]   ;;  %v757_v35 = vld [vmem:[#allocation6 + $0x38] sm:$0xff]  }
  0x1c   : > { %762 = vmatpush.bf16.msra.mxu2 %v717_v1  ;;  %763 = vmatpush.bf16.msra.mxu3 %v717_v1  ;;  %v271_v21 = vmax.f32 %v729_v12, 0.0  ;;  %v272_v22 = vmax.f32 %v730_v13, 0.0  ;;  %v275_v24 = vmax.f32 %v737_v15, 0.0  ;;  %v276_v25 = vmax.f32 %v738_v16, 0.0 }
  0x1d   : > { %v279_v26 = vmax.f32 %v745_v17, 0.0  ;;  %v280_v27 = vmax.f32 %v746_v18, 0.0  ;;  %v283_v28 = vpack.c.bf16 %v268_v20, %v267_v19  ;;  %v725_v36 = vunpack.c.l.bf16 %v751_v32 }
  0x1e   : > { %v285_v29 = vpack.c.bf16 %v272_v22, %v271_v21  ;;  %v287_v30 = vpack.c.bf16 %v276_v25, %v275_v24  ;;  %v726_v37 = vunpack.c.h.bf16 %v751_v32  ;;  %v733_v38 = vunpack.c.l.bf16 %v753_v33 }
  0x1f   : > { %357 = vmatpush.bf16.msra.mxu0 %v716_v2  ;;  %764 = vmatpush.bf16.msra.mxu1 %v716_v2  ;;  %v289_v31 = vpack.c.bf16 %v280_v27, %v279_v26  ;;  %v734_v39 = vunpack.c.h.bf16 %v753_v33  ;;  %v741_v40 = vunpack.c.l.bf16 %v755_v34  ;;  %v742_v41 = vunpack.c.h.bf16 %v755_v34 }
  0x20   : > { %765 = vmatpush.bf16.msra.mxu2 %v716_v2  ;;  %766 = vmatpush.bf16.msra.mxu3 %v716_v2  ;;  %v749_v42 = vunpack.c.l.bf16 %v757_v35  ;;  %v750_v43 = vunpack.c.h.bf16 %v757_v35  ;;  %v269_v44 = vmax.f32 %v725_v36, 0.0  ;;  %v270_v45 = vmax.f32 %v726_v37, 0.0 }
  0x21   : > { %v273_v46 = vmax.f32 %v733_v38, 0.0  ;;  %v274_v47 = vmax.f32 %v734_v39, 0.0  ;;  %v277_v48 = vmax.f32 %v741_v40, 0.0  ;;  %v278_v49 = vmax.f32 %v742_v41, 0.0 }
  0x22   : > { %v281_v50 = vmax.f32 %v749_v42, 0.0  ;;  %v282_v51 = vmax.f32 %v750_v43, 0.0  ;;  %v284_v52 = vpack.c.bf16 %v270_v45, %v269_v44 }
  0x23   : > { %358 = vmatpush.bf16.msra.mxu0 %v715_v3  ;;  %767 = vmatpush.bf16.msra.mxu1 %v715_v3  ;;  %v286_v53 = vpack.c.bf16 %v274_v47, %v273_v46  ;;  %v288_v54 = vpack.c.bf16 %v278_v49, %v277_v48 }
  0x24   : > { %768 = vmatpush.bf16.msra.mxu2 %v715_v3  ;;  %769 = vmatpush.bf16.msra.mxu3 %v715_v3  ;;  %v290_v55 = vpack.c.bf16 %v282_v51, %v281_v50 }
  0x27   : > { %359 = vmatpush.bf16.msra.mxu0 %v714_v4  ;;  %770 = vmatpush.bf16.msra.mxu1 %v714_v4 }
  0x28   : > { %771 = vmatpush.bf16.msra.mxu2 %v714_v4  ;;  %772 = vmatpush.bf16.msra.mxu3 %v714_v4 }
  0x2b   : > { %360 = vmatpush.bf16.msra.mxu0 %v713_v5  ;;  %773 = vmatpush.bf16.msra.mxu1 %v713_v5 }
  0x2c   : > { %774 = vmatpush.bf16.msra.mxu2 %v713_v5  ;;  %775 = vmatpush.bf16.msra.mxu3 %v713_v5 }
  0x2f   : > { %361 = vmatpush.bf16.msra.mxu0 %v712_v14  ;;  %776 = vmatpush.bf16.msra.mxu1 %v712_v14 }
  0x30   : > { %777 = vmatpush.bf16.msra.mxu2 %v712_v14  ;;  %778 = vmatpush.bf16.msra.mxu3 %v712_v14 }
  0x33   : > { %362 = vmatpush.bf16.msra.mxu0 %v711_v23  ;;  %779 = vmatpush.bf16.msra.mxu1 %v711_v23 }
  0x34   : > { %780 = vmatpush.bf16.msra.mxu2 %v711_v23  ;;  %781 = vmatpush.bf16.msra.mxu3 %v711_v23 }
  0x36   : > { %363 = vmatmul.bf16.vlgmr.msra.gmra.mxu0 %v283_v28  ;;  %373 = vmatmul.bf16.vlgmr.msra.gmra.mxu1 %v285_v29 }
  0x37   : > { %383 = vmatmul.bf16.vlgmr.msra.gmra.mxu2 %v287_v30  ;;  %393 = vmatmul.bf16.vlgmr.msra.gmra.mxu3 %v289_v31 }
  0x46   : > { %368 = vmatmul.bf16.gmra.mxu0 %v284_v52  ;;  %378 = vmatmul.bf16.gmra.mxu1 %v286_v53 }
  0x47   : > { %388 = vmatmul.bf16.gmra.mxu2 %v288_v54  ;;  %398 = vmatmul.bf16.gmra.mxu3 %v290_v55 }
  0xb3   : > { %v1057_v56 = vpop.f32.mrf.mxu0  ;;  %v1059_v57 = vpop.f32.mrf.mxu1 }
  0xba   : > { %v1061_v58 = vpop.f32.mrf.mxu2  ;;  %v1063_v59 = vpop.f32.mrf.mxu3 }
  0xbb   : > { %v1065_v60 = vpop.f32.mrf.mxu0  ;;  %v1067_v61 = vpop.f32.mrf.mxu1 }
  0xc2   : > { %v1069_v62 = vpop.f32.mrf.mxu2  ;;  %v1071_v63 = vpop.f32.mrf.mxu3 }
  0xc3   : > { %v1073_v0 = vpop.f32.mrf.mxu0  ;;  %v1075_v1 = vpop.f32.mrf.mxu1 }
  0xca   : > { %v1077_v2 = vpop.f32.mrf.mxu2  ;;  %v1079_v3 = vpop.f32.mrf.mxu3 }
  0xcb   : > { %v1081_v4 = vpop.f32.mrf.mxu0  ;;  %v1083_v5 = vpop.f32.mrf.mxu1 }
  0xce   : > { %407 = sbr.rel (%p705_p7) target bundleno = 298 (0x12a), region = 48 }
  0xd2   : > { %v1085_v6 = vpop.f32.mrf.mxu2  ;;  %v1087_v7 = vpop.f32.mrf.mxu3 }
  0xd3   : > { %v415_v8 = vadd.f32 %v1065_v60, %v1057_v56  ;;  %v976_v9 = vmov 0.0   ;;  %v439_v10 = vmul.f32 %v1057_v56, %v1057_v56  ;;  %v440_v11 = vmul.f32 %v1065_v60, %v1065_v60 }
  0xd4   : > { %412 = vst [vmem:[#allocation2] sm:$0x1] %v976_v9  ;;  %v441_v13 = vmul.f32 %v1073_v0, %v1073_v0  ;;  %v442_v15 = vmul.f32 %v1081_v4, %v1081_v4  ;;  %v443_v18 = vmul.f32 %v1059_v57, %v1059_v57  ;;  %v444_v21 = vmul.f32 %v1067_v61, %v1067_v61 }
  0xd5   : > { %413 = vst [vmem:[#allocation3] sm:$0x1] %v976_v9  ;;  %v416_v12 = vadd.f32 %v415_v8, %v1073_v0  ;;  %v455_v16 = vadd.f32 %v440_v11, %v439_v10  ;;  %v445_v24 = vmul.f32 %v1075_v1, %v1075_v1  ;;  %v446_v27 = vmul.f32 %v1083_v5, %v1083_v5 }
  0xd6   : > { %v447_v30 = vmul.f32 %v1061_v58, %v1061_v58  ;;  %v448_v33 = vmul.f32 %v1069_v62, %v1069_v62  ;;  %v449_v36 = vmul.f32 %v1077_v2, %v1077_v2  ;;  %v450_v39 = vmul.f32 %v1085_v6, %v1085_v6 }
  0xd7   : > { %v417_v14 = vadd.f32 %v416_v12, %v1081_v4  ;;  %v456_v19 = vadd.f32 %v455_v16, %v441_v13  ;;  %v451_v42 = vmul.f32 %v1063_v59, %v1063_v59  ;;  %v452_v45 = vmul.f32 %v1071_v63, %v1071_v63 }
  0xd8   : > { %v453_v48 = vmul.f32 %v1079_v3, %v1079_v3  ;;  %v454_v51 = vmul.f32 %v1087_v7, %v1087_v7 }
  0xd9   : > { %v418_v17 = vadd.f32 %v417_v14, %v1059_v57  ;;  %v457_v22 = vadd.f32 %v456_v19, %v442_v15 }
  0xdb   : > { %v419_v20 = vadd.f32 %v418_v17, %v1067_v61  ;;  %v458_v25 = vadd.f32 %v457_v22, %v443_v18  ;;  %v414_v14 = vld [vmem:[#allocation2] sm:$0x1] }
  0xdd   : > { %v420_v23 = vadd.f32 %v419_v20, %v1075_v1  ;;  %v459_v28 = vadd.f32 %v458_v25, %v444_v21  ;;  %v438_v20 = vld [vmem:[#allocation3] sm:$0x1] }
  0xdf   : > { %v421_v26 = vadd.f32 %v420_v23, %v1083_v5  ;;  %v460_v31 = vadd.f32 %v459_v28, %v445_v24 }
  0xe1   : > { %v422_v29 = vadd.f32 %v421_v26, %v1061_v58  ;;  %v461_v34 = vadd.f32 %v460_v31, %v446_v27 }
  0xe3   : > { %v423_v32 = vadd.f32 %v422_v29, %v1069_v62  ;;  %v462_v37 = vadd.f32 %v461_v34, %v447_v30 }
  0xe5   : > { %v424_v35 = vadd.f32 %v423_v32, %v1077_v2  ;;  %v463_v40 = vadd.f32 %v462_v37, %v448_v33 }
  0xe7   : > { %v425_v38 = vadd.f32 %v424_v35, %v1085_v6  ;;  %v464_v43 = vadd.f32 %v463_v40, %v449_v36  ;;  %v488_v36 = vld [vmem:[%s1180_s2] sm:$0x1] }
  0xe8   : > { %v502_v40 = vld [vmem:[%s1181_s3] sm:$0x1] }
  0xe9   : > { %v426_v41 = vadd.f32 %v425_v38, %v1063_v59  ;;  %v465_v46 = vadd.f32 %v464_v43, %v450_v39 }
  0xeb   : > { %v427_v44 = vadd.f32 %v426_v41, %v1071_v63  ;;  %v466_v49 = vadd.f32 %v465_v46, %v451_v42 }
  0xed   : > { %v428_v47 = vadd.f32 %v427_v44, %v1079_v3  ;;  %v467_v52 = vadd.f32 %v466_v49, %v452_v45 }
  0xef   : > { %v429_v50 = vadd.f32 %v428_v47, %v1087_v7  ;;  %v468_v54 = vadd.f32 %v467_v52, %v453_v48 }
  0xf1   : > { %v430_v53 = vrot.slane %v429_v50, 4  ;;  %v469_v8 = vadd.f32 %v468_v54, %v454_v51 }
  0xf3   : > { %v431_v55 = vadd.f32 %v430_v53, %v429_v50  ;;  %v470_v10 = vrot.slane %v469_v8, 4 }
  0xf5   : > { %v432_v9 = vrot.slane %v431_v55, 2  ;;  %v471_v12 = vadd.f32 %v470_v10, %v469_v8 }
  0xf7   : > { %v433_v11 = vadd.f32 %v432_v9, %v431_v55  ;;  %v472_v15 = vrot.slane %v471_v12, 2 }
  0xf9   : > { %v434_v13 = vrot.slane %v433_v11, 1  ;;  %v473_v17 = vadd.f32 %v472_v15, %v471_v12 }
  0xfb   : > { %v435_v16 = vadd.f32 %v434_v13, %v433_v11  ;;  %v474_v19 = vrot.slane %v473_v17, 1 }
  0xfd   : > { %v436_v18 = vadd.f32 %v435_v16, %v414_v14  ;;  %v475_v21 = vadd.f32 %v474_v19, %v473_v17 }
  0xff   : > { %437 = vst [vmem:[#allocation2] sm:$0x1] %v436_v18  ;;  %v476_v22 = vadd.f32 %v475_v21, %v438_v20 }
 0x101   : > { %477 = vst [vmem:[#allocation3] sm:$0x1] %v476_v22 }
 0x106   : > { %v481_v23 = vld [vmem:[#allocation2] sm:$0x1] }
 0x107   : > { %v482_v24 = vmul.f32 0.0078125, %v481_v23 }
 0x108   : > { %v483_v26 = vld [vmem:[#allocation3] sm:$0x1] }
 0x109   : > { %v485_v25 = vmul.f32 %v482_v24, %v482_v24  ;;  %v484_v27 = vmul.f32 0.0078125, %v483_v26 }
 0x10b   : > { %v486_v28 = vsub.f32 %v484_v27, %v485_v25 }
 0x10d   : > { %v487_v29 = vmax.f32 %v486_v28, 0.0 }
 0x10f   : > { %v489_v30 = vadd.f32 1e-05, %v487_v29 }
 0x111   : > { %844 = vrsqrt.f32 %v489_v30  ;;  %vm496_vm1 = vweird.f32 %v489_v30 }
 0x117   : > { %v845_v31 = vpop.eup %844 }
 0x118   : > { %v491_v32 = vmul.f32 %v845_v31, %v489_v30  ;;  %vm497_vm0 = vweird.f32 %v845_v31 }
 0x119   : > { %vm498_vm2 = vmor %vm496_vm1, %vm497_vm0 }
 0x11a   : > { %v492_v33 = vmul.f32 %v845_v31, %v491_v32 }
 0x11c   : > { %v493_v34 = vmul.f32 0.5, %v492_v33 }
 0x11e   : > { %v494_v35 = vsub.f32 1.5, %v493_v34 }
 0x120   : > { %v495_v37 = vmul.f32 %v845_v31, %v494_v35 }
 0x122   : > { %v499_v38 = vsel %vm498_vm2, %v845_v31, %v495_v37 }
 0x123   : > { %v500_v39 = vmul.f32 %v499_v38, %v488_v36 }
 0x125   : > { %501 = vst [vmem:[#allocation4] sm:$0x1] %v500_v39  ;;  %v503_v41 = vmul.f32 %v500_v39, %v482_v24 }
 0x127   : > { %v504_v42 = vsub.f32 %v502_v40, %v503_v41 }
 0x129   : > { %505 = vst [vmem:[#allocation5] sm:$0x1] %v504_v42 }
 0x12a PF: > { %p706_p8 = scmp.ne.s32.totalorder %s962_s15, 1 }
 0x12c   : > { %509 = sbr.rel (%p706_p8) target bundleno = 326 (0x146), region = 60 }
 0x131   : > { %v846_v43 = vld [vmem:[#allocation4] ss:$0 sm:$0xff]  ;;  %v847_v44 = vld [vmem:[#allocation5] ss:$0 sm:$0xff] }
 0x132   : > { %v514_v45 = vmul.f32 %v846_v43, %v1057_v56  ;;  %v515_v46 = vmul.f32 %v846_v43, %v1065_v60  ;;  %v516_v47 = vmul.f32 %v846_v43, %v1073_v0  ;;  %v517_v48 = vmul.f32 %v846_v43, %v1081_v4 }
 0x133   : > { %v518_v49 = vmul.f32 %v846_v43, %v1059_v57  ;;  %v519_v50 = vmul.f32 %v846_v43, %v1067_v61  ;;  %v520_v54 = vmul.f32 %v846_v43, %v1075_v1  ;;  %v521_v8 = vmul.f32 %v846_v43, %v1083_v5 }
 0x134   : > { %v534_v51 = vadd.f32 %v847_v44, %v514_v45  ;;  %v535_v52 = vadd.f32 %v847_v44, %v515_v46  ;;  %v536_v53 = vadd.f32 %v847_v44, %v516_v47  ;;  %v537_v55 = vadd.f32 %v847_v44, %v517_v48 }
 0x135   : > { %v538_v56 = vadd.f32 %v847_v44, %v518_v49  ;;  %v522_v60 = vmul.f32 %v846_v43, %v1061_v58  ;;  %v539_v0 = vadd.f32 %v847_v44, %v519_v50  ;;  %v523_v4 = vmul.f32 %v846_v43, %v1069_v62 }
 0x136   : > { %550 = vst [vmem:[#allocation11] sm:$0xff] %v534_v51  ;;  %v540_v57 = vadd.f32 %v847_v44, %v520_v54  ;;  %v524_v61 = vmul.f32 %v846_v43, %v1077_v2  ;;  %v541_v9 = vadd.f32 %v847_v44, %v521_v8  ;;  %v525_v10 = vmul.f32 %v846_v43, %v1085_v6 }
 0x137   : > { %551 = vst [vmem:[#allocation11 + $0x8] sm:$0xff] %v535_v52  ;;  %v542_v1 = vadd.f32 %v847_v44, %v522_v60  ;;  %v526_v5 = vmul.f32 %v846_v43, %v1063_v59  ;;  %v543_v11 = vadd.f32 %v847_v44, %v523_v4  ;;  %v527_v58 = vmul.f32 %v846_v43, %v1071_v63 }
 0x138   : > { %552 = vst [vmem:[#allocation11 + $0x10] sm:$0xff] %v536_v53  ;;  %v544_v12 = vadd.f32 %v847_v44, %v524_v61  ;;  %v528_v62 = vmul.f32 %v846_v43, %v1079_v3  ;;  %v545_v13 = vadd.f32 %v847_v44, %v525_v10  ;;  %v529_v2 = vmul.f32 %v846_v43, %v1087_v7 }
 0x139   : > { %553 = vst [vmem:[#allocation11 + $0x18] sm:$0xff] %v537_v55  ;;  %v546_v14 = vadd.f32 %v847_v44, %v526_v5  ;;  %v547_v6 = vadd.f32 %v847_v44, %v527_v58 }
 0x13a   : > { %554 = vst [vmem:[#allocation11 + $0x20] sm:$0xff] %v538_v56  ;;  %v548_v15 = vadd.f32 %v847_v44, %v528_v62  ;;  %v549_v59 = vadd.f32 %v847_v44, %v529_v2 }
 0x13b   : > { %555 = vst [vmem:[#allocation11 + $0x28] sm:$0xff] %v539_v0 }
 0x13c   : > { %556 = vst [vmem:[#allocation11 + $0x30] sm:$0xff] %v540_v57 }
 0x13d   : > { %557 = vst [vmem:[#allocation11 + $0x38] sm:$0xff] %v541_v9 }
 0x13e   : > { %558 = vst [vmem:[#allocation11 + $0x40] sm:$0xff] %v542_v1 }
 0x13f   : > { %559 = vst [vmem:[#allocation11 + $0x48] sm:$0xff] %v543_v11 }
 0x140   : > { %560 = vst [vmem:[#allocation11 + $0x50] sm:$0xff] %v544_v12 }
 0x141   : > { %561 = vst [vmem:[#allocation11 + $0x58] sm:$0xff] %v545_v13 }
 0x142   : > { %562 = vst [vmem:[#allocation11 + $0x60] sm:$0xff] %v546_v14 }
 0x143   : > { %563 = vst [vmem:[#allocation11 + $0x68] sm:$0xff] %v547_v6 }
 0x144   : > { %564 = vst [vmem:[#allocation11 + $0x70] sm:$0xff] %v548_v15 }
 0x145   : > { %565 = vst [vmem:[#allocation11 + $0x78] sm:$0xff] %v549_v59 }
 0x146 PF: > { %p809_p9 = scmp.eq.s32.totalorder %s665_s18, 1  ;;  %s582_s15 = sshll.u32 %s1182_s4, 4  ;;  %s583_s15 = int_to_ptr.hbm [resolvable:$true] %s582_s15 }
 0x147   : > { %s977_s21 = smov [#allocation11]   ;;  %s978_s23 = smov 128  }
 0x148   : > { %s580_s22 = sshll.u32 %s977_s21, 4  ;;  %s979_s24 = smov 8   ;;  %s581_s22 = int_to_ptr.vmem [resolvable:$true] %s580_s22 }
 0x149   : > { %791 = dma.vmem_to_hbm [thread:$0]  (%p809_p9), %s581_s22, 2048, %s583_s15, [#allocation8], %s978_s23, %s978_s23, %s979_s24  }
 0x14a PF: > { %p810_p10 = scmp.ge.s32.totalorder %s970_s17, 2  ;;  %p811_p11 = scmp.eq.s32.totalorder %s666_s19, 1 }
 0x14c   : > { %p802_p12 = pnand %p811_p11, %p810_p10 }
 0x14e   : > { %p803_p13 = pneg %p802_p12 }
 0x150   : > { %957 = dma.done.wait (%p803_p13), [#allocation8], 2048  }
 0x151   : > { %959 = vsyncadd (%p803_p13), [#allocation8], 4294965248  ;;  %s19_s17 = sadd.s32 1, %s970_s17   ;;  %s1185_s15 = smov %s966_s16 }
 0x152   : > { %p16_p0 = scmp.ge.s32.totalorder %s19_s17, 4   ;;  %s1186_s16 = smov %s1188_s20 }
 0x154   :  { %18 = sbr.rel (!%p16_p0) target bundleno = 5 (0x5), region = 94 }
 0x159   :  { %604 = vsyncpa [#allocation7], 1 }
 0x15a   :  { %606 = vsyncpa [#allocation7 + $0x1], 1 }
 0x15b   :  { %607 = vsyncpa [#allocation10], 1 }
 0x15c   :  { %608 = vsyncpa [#allocation8], 1 }
 0x15d   :  { %610 = vsyncpa [#allocation8 + $0x1], 1 }

</bundles_post_ra>
